<compile_context>
chip_gen: v7x
topology: tpu7x:2x2x1
jax: 0.10.0
libtpu: 0.0.40
codegen_flags: <defaults>
</compile_context>

<pallas_src>
import numpy as np

import jax
import jax.numpy as jnp
from jax.experimental import pallas as pl
from jax.experimental.pallas import tpu as pltpu


# Fixed im2col packing geometry, shared by the host weight packer and the kernel.
CBLK = 16                      # rows per tap block (input channels padded to 16)
NTAP = 9                       # tap blocks per layer (3x3 taps / 3x3 shift classes)
SHIFT_ROW = NTAP * CBLK        # 144: start of the all-ones block (folded BN shift)
KDIM = SHIFT_ROW + CBLK        # 160: K extent of every im2col GEMM


# ----------------------------------------------------------------------------
# One-time host-side weight packing (numpy; no per-call XLA ops)
# ----------------------------------------------------------------------------

def _pack_conv0_pool(w_oihw, scale, shift):
    """Conv0 (4x4, valid) weights for the fused conv+BN+pool GEMM.

    Output rows = pool-parity-class * CBLK + out_channel.  K columns = the 9
    (row-offset, col-offset) shift blocks of the parity-split input plus the
    ones-row column carrying the per-channel BN shift."""
    w = np.asarray(w_oihw, np.float32) * np.asarray(scale, np.float32)[:, None, None, None]
    shift = np.asarray(shift, np.float32)
    co_n, ci_n, k, _ = w.shape
    out = np.zeros((4 * CBLK, KDIM), np.float32)
    for a in range(2):
        for b in range(2):
            for co in range(co_n):
                row = (a * 2 + b) * CBLK + co
                for kh in range(k):
                    for kw in range(k):
                        p, roff = (a + kh) % 2, (a + kh) // 2
                        q, soff = (b + kw) % 2, (b + kw) // 2
                        for ci in range(ci_n):
                            col = (roff * 3 + soff) * CBLK + (p * 2 + q) * ci_n + ci
                            out[row, col] = w[co, ci, kh, kw]
                out[row, SHIFT_ROW] = shift[co]
    return jnp.asarray(out, jnp.bfloat16)


def _pack_conv3x3(w_oihw, scale, shift, *, out_rows):
    """3x3 'same' conv weights; K columns = 9 tap blocks + BN-shift column."""
    w = np.asarray(w_oihw, np.float32) * np.asarray(scale, np.float32)[:, None, None, None]
    shift = np.asarray(shift, np.float32)
    co_n, ci_n, _, _ = w.shape
    out = np.zeros((out_rows, KDIM), np.float32)
    for co in range(co_n):
        for dh in range(3):
            for dw in range(3):
                c0 = (dh * 3 + dw) * CBLK
                out[co, c0:c0 + ci_n] = w[co, :, dh, dw]
        out[co, SHIFT_ROW] = shift[co]
    return jnp.asarray(out, jnp.bfloat16)


def pack_encoder_params(params):
    """Pack (Conv2d OIHW weight, BN scale, BN shift) triples into the
    block-structured bf16 im2col-GEMM weights used by the kernel."""
    (w0, s0, t0), (w1, s1, t1), (w2, s2, t2) = params
    return (_pack_conv0_pool(w0, s0, t0),
            _pack_conv3x3(w1, s1, t1, out_rows=CBLK),          # 4->8, rows 8..15 zero
            _pack_conv3x3(w2, s2, t2, out_rows=int(w2.shape[0])))   # 8->8


# ----------------------------------------------------------------------------
# Fused encoder: single pallas_call (all glue under one jit)
# ----------------------------------------------------------------------------

@jax.jit
def encoder_forward(x_nchw, packed_weights):
    """Pallas Encoder forward.  Returns (x, route_connection) like the module."""
    w0p, w1p, w2p = packed_weights
    n, c0, h, w = x_nchw.shape
    k0 = 4
    assert c0 == 2 and h == w and (h - k0 + 1) % 2 == 0, \
        "kernel specialized to the runnable Encoder config (2-ch input, even conv0 output)"
    pooled = (h - k0 + 1) // 2             # 8   (spatial after conv0 + 2x2 pool)
    grid = (h + 1) // 2                    # 10  (parity grid per image, incl. guard band)
    assert grid >= pooled + 2
    per_img = grid * grid                  # 100
    valid = n * per_img                    # 200
    lanes = pl.cdiv(valid, 128) * 128      # 256 (lane-dense working width)
    assert lanes - valid >= grid + 1       # zero tail covers negative-tap lane wraps
    c2 = w2p.shape[0]                      # 8

    # Input prep: pad to even spatial, single reshape-based space-to-depth into
    # the channel-planar lane-dense layout xq[(p*2+q)*c0 + ci, n*100 + r*10 + s].
    xp = jnp.pad(x_nchw.astype(jnp.float32),
                 ((0, 0), (0, 0), (0, 2 * grid - h), (0, 2 * grid - w)))
    xq = xp.reshape(n, c0, grid, 2, grid, 2)
    xq = jnp.transpose(xq, (3, 5, 1, 0, 2, 4)).reshape(4 * c0, valid)
    xq = jnp.pad(xq, ((0, CBLK - 4 * c0), (0, lanes - valid)))

    # Valid-lane mask (lane belongs to the pooled 8x8 grid of some image);
    # built with numpy at trace time -> baked-in constant, zero runtime cost.
    li = np.arange(lanes)
    mask_np = ((li < valid) & ((li % per_img) // grid < pooled) & (li % grid < pooled))
    mask = jnp.asarray(mask_np.astype(np.float32)[None, :])

    # Lane shifts realising each layer's taps on the 10-stride planar grid.
    shifts0 = tuple(ro * grid + so for ro in range(3) for so in range(3))
    shifts3 = tuple((dh - 1) * grid + (dw - 1) for dh in range(3) for dw in range(3))

    def kernel(xq_ref, w0_ref, w1_ref, w2_ref, mask_ref, o_ref, patch_ref):
        msk = mask_ref[...]                                     # (1, lanes) f32

        # Ones block feeding the folded-BN-shift column of every GEMM (written once).
        patch_ref[SHIFT_ROW:SHIFT_ROW + CBLK, :] = jnp.ones(
            (CBLK, lanes), jnp.bfloat16)

        def assemble(src, shifts):
            # 9 lane-rolled (XLU) tap blocks -> aligned 16-row bf16 stores.
            for t, sh in enumerate(shifts):
                blk = src if sh == 0 else pltpu.roll(src, (-sh) % lanes, axis=1)
                patch_ref[t * CBLK:(t + 1) * CBLK, :] = blk.astype(jnp.bfloat16)

        # ---- layer 0: Conv2d(2->4, 4x4, valid) + BN + ReLU + MaxPool2x2 : ONE GEMM
        assemble(xq_ref[...], shifts0)
        z = jnp.dot(w0_ref[...], patch_ref[...],
                    preferred_element_type=jnp.float32)         # (4*CBLK, lanes)
        # rows = pool-class*CBLK + channel; BN scale AND shift are already in z
        # per class, so this max == MaxPool(BN(conv)) for any gamma sign, and
        # ReLU commutes with max.
        z = jnp.maximum(jnp.maximum(z[0:CBLK], z[CBLK:2 * CBLK]),
                        jnp.maximum(z[2 * CBLK:3 * CBLK], z[3 * CBLK:4 * CBLK]))
        y = jnp.maximum(z, 0.0) * msk                           # (CBLK, lanes)

        # ---- layer 1: Conv2d(4->8, 3x3, pad 1) + BN + ReLU : ONE GEMM
        assemble(y, shifts3)
        z = jnp.dot(w1_ref[...], patch_ref[...],
                    preferred_element_type=jnp.float32)         # (CBLK, lanes)
        y = jnp.maximum(z, 0.0) * msk

        # ---- layer 2: Conv2d(8->8, 3x3, pad 1) + BN + ReLU : ONE GEMM
        assemble(y, shifts3)
        z = jnp.dot(w2_ref[...], patch_ref[...],
                    preferred_element_type=jnp.float32)         # (c2, lanes)
        o_ref[...] = (jnp.maximum(z, 0.0) * msk).astype(o_ref.dtype)

    out_planar = pl.pallas_call(
        kernel,
        out_shape=jax.ShapeDtypeStruct((c2, lanes), jnp.float32),
        grid=(1,),
        in_specs=[
            pl.BlockSpec(xq.shape, lambda i: (0, 0)),
            pl.BlockSpec(w0p.shape, lambda i: (0, 0)),
            pl.BlockSpec(w1p.shape, lambda i: (0, 0)),
            pl.BlockSpec(w2p.shape, lambda i: (0, 0)),
            pl.BlockSpec(mask.shape, lambda i: (0, 0)),
        ],
        out_specs=pl.BlockSpec((c2, lanes), lambda i: (0, 0)),
        scratch_shapes=[pltpu.VMEM((KDIM, lanes), jnp.bfloat16)],
        compiler_params=pltpu.CompilerParams(
            dimension_semantics=("arbitrary",)),
    )(xq, w0p, w1p, w2p, mask)

    # Output unpacking: drop the guard band, back to NCHW.
    out = out_planar[:, :valid].reshape(c2, n, grid, grid)[:, :, :pooled, :pooled]
    out = jnp.transpose(out, (1, 0, 2, 3))
    # Only the final CNNBlocks layer is recorded in route_connection.
    return out, [out]


# ----------------------------------------------------------------------------
# Parameter init (deterministic, synthetic)
# ----------------------------------------------------------------------------

def init_cnnblock_params(key, c_in, c_out, k):
    """Deterministic Conv2d(bias=False) + BatchNorm2d(eval) params:
    (OIHW weight, folded BN scale, folded BN shift).  Gamma signs are mixed on
    purpose to exercise the negative-gamma / fused-maxpool correctness path."""
    k1, k2, k3, k4, k5 = jax.random.split(key, 5)
    w_oihw = 0.1 * jax.random.normal(k1, (c_out, c_in, k, k), jnp.float32)
    gamma = 1.0 + 0.1 * jax.random.normal(k2, (c_out,), jnp.float32)
    gamma = gamma * jnp.where(jnp.arange(c_out) % 3 == 2, -1.0, 1.0)
    beta = 0.1 * jax.random.normal(k3, (c_out,), jnp.float32)
    run_mean = 0.1 * jax.random.normal(k4, (c_out,), jnp.float32)
    run_var = 0.5 + jax.nn.softplus(jax.random.normal(k5, (c_out,), jnp.float32))
    eps = 1e-5
    scale = gamma / jnp.sqrt(run_var + eps)
    shift = beta - run_mean * scale
    return w_oihw, scale, shift


# ----------------------------------------------------------------------------
# Pure-JAX reference (uses un-packed weights / BN affine)
# ----------------------------------------------------------------------------

def _conv_bn_relu_ref(x_nhwc, w_oihw, scale, shift, *, padding):
    w_hwio = jnp.transpose(w_oihw, (2, 3, 1, 0))
    y = jax.lax.conv_general_dilated(
        x_nhwc, w_hwio, window_strides=(1, 1),
        padding=((padding, padding), (padding, padding)),
        dimension_numbers=("NHWC", "HWIO", "NHWC"))
    return jnp.maximum(y * scale + shift, 0.0)


def _maxpool2x2_ref(x_nhwc):
    return jax.lax.reduce_window(
        x_nhwc, -jnp.inf, jax.lax.max,
        window_dimensions=(1, 2, 2, 1), window_strides=(1, 2, 2, 1),
        padding="VALID")


def encoder_forward_ref(x_nchw, params, *, padding=1):
    x = jnp.transpose(x_nchw, (0, 2, 3, 1))
    (w0, s0, t0), (w1, s1, t1), (w2, s2, t2) = params
    x = _conv_bn_relu_ref(x, w0, s0, t0, padding=0)
    x = _maxpool2x2_ref(x)
    x = _conv_bn_relu_ref(x, w1, s1, t1, padding=padding)
    x = _conv_bn_relu_ref(x, w2, s2, t2, padding=padding)
    out = jnp.transpose(x, (0, 3, 1, 2))
    return out, [out]


# ----------------------------------------------------------------------------
# Main
# ----------------------------------------------------------------------------

if __name__ == "__main__":
    # Encoder(in_channels=4, out_channels=4, padding=1, donwhill=1) -- the
    # runnable configuration of the module as literally written (see header).
    IN_CH, OUT_CH, PADDING = 4, 4, 1
    N, H, W = 2, 19, 19                      # input x: (N, 2, H, W), NCHW

    root = jax.random.PRNGKey(0)
    kx, k0, k1, k2 = jax.random.split(root, 4)
    x = jax.random.normal(kx, (N, 2, H, W), jnp.float32)

    params = [
        # enc_layers[0]: Conv2d(2, IN_CH, kernel_size=OUT_CH, stride=PADDING, pad=0)
        init_cnnblock_params(k0, 2, IN_CH, OUT_CH),
        # enc_layers[2].layers[0]: Conv2d(IN_CH, 2*OUT_CH, 3, 1, PADDING)
        init_cnnblock_params(k1, IN_CH, 2 * OUT_CH, 3),
        # enc_layers[2].layers[1]: Conv2d(2*OUT_CH, 2*OUT_CH, 3, 1, PADDING)
        init_cnnblock_params(k2, 2 * OUT_CH, 2 * OUT_CH, 3),
    ]

    packed = pack_encoder_params(params)     # one-time numpy weight packing
    out, route = encoder_forward(x, packed)
    out = jax.block_until_ready(out)

    ref_out, _ = encoder_forward_ref(x, params, padding=PADDING)
    assert out.shape == (N, 2 * OUT_CH, 8, 8), out.shape
    assert len(route) == 1 and route[0].shape == out.shape
    # Tolerance sized for bf16 MXU operands (accumulation is f32).
    assert jnp.allclose(out, ref_out, atol=2e-2, rtol=2e-2), float(
        jnp.max(jnp.abs(out - ref_out)))
    print("KERNEL_OK")
</pallas_src>

<mosaic_0001>
module attributes {stable_mosaic.version = 11 : i64} {
  func.func @kernel(%arg0: i32, %arg1: memref<16x256xf32, #tpu.memory_space<vmem>>, %arg2: memref<64x160xbf16, #tpu.memory_space<vmem>>, %arg3: memref<16x160xbf16, #tpu.memory_space<vmem>>, %arg4: memref<8x160xbf16, #tpu.memory_space<vmem>>, %arg5: memref<1x256xf32, #tpu.memory_space<vmem>>, %arg6: memref<8x256xf32, #tpu.memory_space<vmem>>, %arg7: memref<160x256xbf16, #tpu.memory_space<vmem>>) attributes {dimension_semantics = [#tpu.dimension_semantics<arbitrary>], iteration_bounds = array<i64: 1>, scalar_prefetch = 0 : i64, scratch_operands = 1 : i64, tpu.core_type = #tpu.core_type<tc>, window_params = [{pipeline_mode = #tpu.pipeline_mode<synchronous>, transform_indices = @transform_0, window_bounds = array<i64: 16, 256>}, {pipeline_mode = #tpu.pipeline_mode<synchronous>, transform_indices = @transform_1, window_bounds = array<i64: 64, 160>}, {pipeline_mode = #tpu.pipeline_mode<synchronous>, transform_indices = @transform_2, window_bounds = array<i64: 16, 160>}, {pipeline_mode = #tpu.pipeline_mode<synchronous>, transform_indices = @transform_3, window_bounds = array<i64: 8, 160>}, {pipeline_mode = #tpu.pipeline_mode<synchronous>, transform_indices = @transform_4, window_bounds = array<i64: 1, 256>}, {pipeline_mode = #tpu.pipeline_mode<synchronous>, transform_indices = @transform_5, window_bounds = array<i64: 8, 256>}]} {
    %c0 = arith.constant 0 : index
    %c0_0 = arith.constant 0 : index
    %0 = vector.load %arg5[%c0, %c0_0] : memref<1x256xf32, #tpu.memory_space<vmem>>, vector<1x256xf32>
    %cst = arith.constant 1.000000e+00 : bf16
    %1 = vector.broadcast %cst : bf16 to vector<16x256xbf16>
    %c144 = arith.constant 144 : index
    %c0_1 = arith.constant 0 : index
    %2 = vector.load %arg7[%c144, %c0_1] : memref<160x256xbf16, #tpu.memory_space<vmem>>, vector<16x256xbf16>
    tpu.vector_store %arg7[%c144, %c0_1], %1 {strides = array<i32>} : memref<160x256xbf16, #tpu.memory_space<vmem>>, vector<16x256xbf16>,
    %c0_2 = arith.constant 0 : index
    %c0_3 = arith.constant 0 : index
    %3 = vector.load %arg1[%c0_2, %c0_3] : memref<16x256xf32, #tpu.memory_space<vmem>>, vector<16x256xf32>
    %4 = arith.truncf %3 : vector<16x256xf32> to vector<16x256xbf16>
    %c0_4 = arith.constant 0 : index
    %c0_5 = arith.constant 0 : index
    %5 = vector.load %arg7[%c0_4, %c0_5] : memref<160x256xbf16, #tpu.memory_space<vmem>>, vector<16x256xbf16>
    tpu.vector_store %arg7[%c0_4, %c0_5], %4 {strides = array<i32>} : memref<160x256xbf16, #tpu.memory_space<vmem>>, vector<16x256xbf16>,
    %c255_i32 = arith.constant 255 : i32
    %6 = tpu.dynamic_rotate %3 by %c255_i32 dim 1 : vector<16x256xf32>, i32 -> vector<16x256xf32>
    %7 = arith.truncf %6 : vector<16x256xf32> to vector<16x256xbf16>
    %c16 = arith.constant 16 : index
    %c0_6 = arith.constant 0 : index
    %8 = vector.load %arg7[%c16, %c0_6] : memref<160x256xbf16, #tpu.memory_space<vmem>>, vector<16x256xbf16>
    tpu.vector_store %arg7[%c16, %c0_6], %7 {strides = array<i32>} : memref<160x256xbf16, #tpu.memory_space<vmem>>, vector<16x256xbf16>,
    %c254_i32 = arith.constant 254 : i32
    %9 = tpu.dynamic_rotate %3 by %c254_i32 dim 1 : vector<16x256xf32>, i32 -> vector<16x256xf32>
    %10 = arith.truncf %9 : vector<16x256xf32> to vector<16x256xbf16>
    %c32 = arith.constant 32 : index
    %c0_7 = arith.constant 0 : index
    %11 = vector.load %arg7[%c32, %c0_7] : memref<160x256xbf16, #tpu.memory_space<vmem>>, vector<16x256xbf16>
    tpu.vector_store %arg7[%c32, %c0_7], %10 {strides = array<i32>} : memref<160x256xbf16, #tpu.memory_space<vmem>>, vector<16x256xbf16>,
    %c246_i32 = arith.constant 246 : i32
    %12 = tpu.dynamic_rotate %3 by %c246_i32 dim 1 : vector<16x256xf32>, i32 -> vector<16x256xf32>
    %13 = arith.truncf %12 : vector<16x256xf32> to vector<16x256xbf16>
    %c48 = arith.constant 48 : index
    %c0_8 = arith.constant 0 : index
    %14 = vector.load %arg7[%c48, %c0_8] : memref<160x256xbf16, #tpu.memory_space<vmem>>, vector<16x256xbf16>
    tpu.vector_store %arg7[%c48, %c0_8], %13 {strides = array<i32>} : memref<160x256xbf16, #tpu.memory_space<vmem>>, vector<16x256xbf16>,
    %c245_i32 = arith.constant 245 : i32
    %15 = tpu.dynamic_rotate %3 by %c245_i32 dim 1 : vector<16x256xf32>, i32 -> vector<16x256xf32>
    %16 = arith.truncf %15 : vector<16x256xf32> to vector<16x256xbf16>
    %c64 = arith.constant 64 : index
    %c0_9 = arith.constant 0 : index
    %17 = vector.load %arg7[%c64, %c0_9] : memref<160x256xbf16, #tpu.memory_space<vmem>>, vector<16x256xbf16>
    tpu.vector_store %arg7[%c64, %c0_9], %16 {strides = array<i32>} : memref<160x256xbf16, #tpu.memory_space<vmem>>, vector<16x256xbf16>,
    %c244_i32 = arith.constant 244 : i32
    %18 = tpu.dynamic_rotate %3 by %c244_i32 dim 1 : vector<16x256xf32>, i32 -> vector<16x256xf32>
    %19 = arith.truncf %18 : vector<16x256xf32> to vector<16x256xbf16>
    %c80 = arith.constant 80 : index
    %c0_10 = arith.constant 0 : index
    %20 = vector.load %arg7[%c80, %c0_10] : memref<160x256xbf16, #tpu.memory_space<vmem>>, vector<16x256xbf16>
    tpu.vector_store %arg7[%c80, %c0_10], %19 {strides = array<i32>} : memref<160x256xbf16, #tpu.memory_space<vmem>>, vector<16x256xbf16>,
    %c236_i32 = arith.constant 236 : i32
    %21 = tpu.dynamic_rotate %3 by %c236_i32 dim 1 : vector<16x256xf32>, i32 -> vector<16x256xf32>
    %22 = arith.truncf %21 : vector<16x256xf32> to vector<16x256xbf16>
    %c96 = arith.constant 96 : index
    %c0_11 = arith.constant 0 : index
    %23 = vector.load %arg7[%c96, %c0_11] : memref<160x256xbf16, #tpu.memory_space<vmem>>, vector<16x256xbf16>
    tpu.vector_store %arg7[%c96, %c0_11], %22 {strides = array<i32>} : memref<160x256xbf16, #tpu.memory_space<vmem>>, vector<16x256xbf16>,
    %c235_i32 = arith.constant 235 : i32
    %24 = tpu.dynamic_rotate %3 by %c235_i32 dim 1 : vector<16x256xf32>, i32 -> vector<16x256xf32>
    %25 = arith.truncf %24 : vector<16x256xf32> to vector<16x256xbf16>
    %c112 = arith.constant 112 : index
    %c0_12 = arith.constant 0 : index
    %26 = vector.load %arg7[%c112, %c0_12] : memref<160x256xbf16, #tpu.memory_space<vmem>>, vector<16x256xbf16>
    tpu.vector_store %arg7[%c112, %c0_12], %25 {strides = array<i32>} : memref<160x256xbf16, #tpu.memory_space<vmem>>, vector<16x256xbf16>,
    %c234_i32 = arith.constant 234 : i32
    %27 = tpu.dynamic_rotate %3 by %c234_i32 dim 1 : vector<16x256xf32>, i32 -> vector<16x256xf32>
    %28 = arith.truncf %27 : vector<16x256xf32> to vector<16x256xbf16>
    %c128 = arith.constant 128 : index
    %c0_13 = arith.constant 0 : index
    %29 = vector.load %arg7[%c128, %c0_13] : memref<160x256xbf16, #tpu.memory_space<vmem>>, vector<16x256xbf16>
    tpu.vector_store %arg7[%c128, %c0_13], %28 {strides = array<i32>} : memref<160x256xbf16, #tpu.memory_space<vmem>>, vector<16x256xbf16>,
    %c0_14 = arith.constant 0 : index
    %c0_15 = arith.constant 0 : index
    %30 = vector.load %arg2[%c0_14, %c0_15] : memref<64x160xbf16, #tpu.memory_space<vmem>>, vector<64x160xbf16>
    %c0_16 = arith.constant 0 : index
    %c0_17 = arith.constant 0 : index
    %31 = vector.load %arg7[%c0_16, %c0_17] : memref<160x256xbf16, #tpu.memory_space<vmem>>, vector<160x256xbf16>
    %cst_18 = arith.constant dense<0.000000e+00> : vector<64x256xf32>
    %32 = tpu.matmul %30, %31, %cst_18 {dimension_numbers = #tpu.dot_dimension_numbers<[1], [0], [0], [1], [0, 0, 1, 1], [], []>} : vector<64x160xbf16>, vector<160x256xbf16>, vector<64x256xf32> -> vector<64x256xf32>
    %33 = vector.extract_strided_slice %32 {offsets = [0, 0], sizes = [16, 256], strides = [1, 1]} : vector<64x256xf32> to vector<16x256xf32>
    %34 = vector.extract_strided_slice %32 {offsets = [16, 0], sizes = [16, 256], strides = [1, 1]} : vector<64x256xf32> to vector<16x256xf32>
    %35 = arith.maximumf %33, %34 : vector<16x256xf32>
    %36 = vector.extract_strided_slice %32 {offsets = [32, 0], sizes = [16, 256], strides = [1, 1]} : vector<64x256xf32> to vector<16x256xf32>
    %37 = vector.extract_strided_slice %32 {offsets = [48, 0], sizes = [16, 256], strides = [1, 1]} : vector<64x256xf32> to vector<16x256xf32>
    %38 = arith.maximumf %36, %37 : vector<16x256xf32>
    %39 = arith.maximumf %35, %38 : vector<16x256xf32>
    %cst_19 = arith.constant 0.000000e+00 : f32
    %40 = vector.broadcast %cst_19 : f32 to vector<16x256xf32>
    %41 = arith.maximumf %39, %40 : vector<16x256xf32>
    %42 = vector.broadcast %0 : vector<1x256xf32> to vector<16x256xf32>
    %43 = arith.mulf %41, %42 : vector<16x256xf32>
    %c11_i32 = arith.constant 11 : i32
    %44 = tpu.dynamic_rotate %43 by %c11_i32 dim 1 : vector<16x256xf32>, i32 -> vector<16x256xf32>
    %45 = arith.truncf %44 : vector<16x256xf32> to vector<16x256xbf16>
    %c0_20 = arith.constant 0 : index
    %c0_21 = arith.constant 0 : index
    %46 = vector.load %arg7[%c0_20, %c0_21] : memref<160x256xbf16, #tpu.memory_space<vmem>>, vector<16x256xbf16>
    tpu.vector_store %arg7[%c0_20, %c0_21], %45 {strides = array<i32>} : memref<160x256xbf16, #tpu.memory_space<vmem>>, vector<16x256xbf16>,
    %c10_i32 = arith.constant 10 : i32
    %47 = tpu.dynamic_rotate %43 by %c10_i32 dim 1 : vector<16x256xf32>, i32 -> vector<16x256xf32>
    %48 = arith.truncf %47 : vector<16x256xf32> to vector<16x256xbf16>
    %c16_22 = arith.constant 16 : index
    %c0_23 = arith.constant 0 : index
    %49 = vector.load %arg7[%c16_22, %c0_23] : memref<160x256xbf16, #tpu.memory_space<vmem>>, vector<16x256xbf16>
    tpu.vector_store %arg7[%c16_22, %c0_23], %48 {strides = array<i32>} : memref<160x256xbf16, #tpu.memory_space<vmem>>, vector<16x256xbf16>,
    %c9_i32 = arith.constant 9 : i32
    %50 = tpu.dynamic_rotate %43 by %c9_i32 dim 1 : vector<16x256xf32>, i32 -> vector<16x256xf32>
    %51 = arith.truncf %50 : vector<16x256xf32> to vector<16x256xbf16>
    %c32_24 = arith.constant 32 : index
    %c0_25 = arith.constant 0 : index
    %52 = vector.load %arg7[%c32_24, %c0_25] : memref<160x256xbf16, #tpu.memory_space<vmem>>, vector<16x256xbf16>
    tpu.vector_store %arg7[%c32_24, %c0_25], %51 {strides = array<i32>} : memref<160x256xbf16, #tpu.memory_space<vmem>>, vector<16x256xbf16>,
    %c1_i32 = arith.constant 1 : i32
    %53 = tpu.dynamic_rotate %43 by %c1_i32 dim 1 : vector<16x256xf32>, i32 -> vector<16x256xf32>
    %54 = arith.truncf %53 : vector<16x256xf32> to vector<16x256xbf16>
    %c48_26 = arith.constant 48 : index
    %c0_27 = arith.constant 0 : index
    %55 = vector.load %arg7[%c48_26, %c0_27] : memref<160x256xbf16, #tpu.memory_space<vmem>>, vector<16x256xbf16>
    tpu.vector_store %arg7[%c48_26, %c0_27], %54 {strides = array<i32>} : memref<160x256xbf16, #tpu.memory_space<vmem>>, vector<16x256xbf16>,
    %56 = arith.truncf %43 : vector<16x256xf32> to vector<16x256xbf16>
    %c64_28 = arith.constant 64 : index
    %c0_29 = arith.constant 0 : index
    %57 = vector.load %arg7[%c64_28, %c0_29] : memref<160x256xbf16, #tpu.memory_space<vmem>>, vector<16x256xbf16>
    tpu.vector_store %arg7[%c64_28, %c0_29], %56 {strides = array<i32>} : memref<160x256xbf16, #tpu.memory_space<vmem>>, vector<16x256xbf16>,
    %c255_i32_30 = arith.constant 255 : i32
    %58 = tpu.dynamic_rotate %43 by %c255_i32_30 dim 1 : vector<16x256xf32>, i32 -> vector<16x256xf32>
    %59 = arith.truncf %58 : vector<16x256xf32> to vector<16x256xbf16>
    %c80_31 = arith.constant 80 : index
    %c0_32 = arith.constant 0 : index
    %60 = vector.load %arg7[%c80_31, %c0_32] : memref<160x256xbf16, #tpu.memory_space<vmem>>, vector<16x256xbf16>
    tpu.vector_store %arg7[%c80_31, %c0_32], %59 {strides = array<i32>} : memref<160x256xbf16, #tpu.memory_space<vmem>>, vector<16x256xbf16>,
    %c247_i32 = arith.constant 247 : i32
    %61 = tpu.dynamic_rotate %43 by %c247_i32 dim 1 : vector<16x256xf32>, i32 -> vector<16x256xf32>
    %62 = arith.truncf %61 : vector<16x256xf32> to vector<16x256xbf16>
    %c96_33 = arith.constant 96 : index
    %c0_34 = arith.constant 0 : index
    %63 = vector.load %arg7[%c96_33, %c0_34] : memref<160x256xbf16, #tpu.memory_space<vmem>>, vector<16x256xbf16>
    tpu.vector_store %arg7[%c96_33, %c0_34], %62 {strides = array<i32>} : memref<160x256xbf16, #tpu.memory_space<vmem>>, vector<16x256xbf16>,
    %c246_i32_35 = arith.constant 246 : i32
    %64 = tpu.dynamic_rotate %43 by %c246_i32_35 dim 1 : vector<16x256xf32>, i32 -> vector<16x256xf32>
    %65 = arith.truncf %64 : vector<16x256xf32> to vector<16x256xbf16>
    %c112_36 = arith.constant 112 : index
    %c0_37 = arith.constant 0 : index
    %66 = vector.load %arg7[%c112_36, %c0_37] : memref<160x256xbf16, #tpu.memory_space<vmem>>, vector<16x256xbf16>
    tpu.vector_store %arg7[%c112_36, %c0_37], %65 {strides = array<i32>} : memref<160x256xbf16, #tpu.memory_space<vmem>>, vector<16x256xbf16>,
    %c245_i32_38 = arith.constant 245 : i32
    %67 = tpu.dynamic_rotate %43 by %c245_i32_38 dim 1 : vector<16x256xf32>, i32 -> vector<16x256xf32>
    %68 = arith.truncf %67 : vector<16x256xf32> to vector<16x256xbf16>
    %c128_39 = arith.constant 128 : index
    %c0_40 = arith.constant 0 : index
    %69 = vector.load %arg7[%c128_39, %c0_40] : memref<160x256xbf16, #tpu.memory_space<vmem>>, vector<16x256xbf16>
    tpu.vector_store %arg7[%c128_39, %c0_40], %68 {strides = array<i32>} : memref<160x256xbf16, #tpu.memory_space<vmem>>, vector<16x256xbf16>,
    %c0_41 = arith.constant 0 : index
    %c0_42 = arith.constant 0 : index
    %70 = vector.load %arg3[%c0_41, %c0_42] : memref<16x160xbf16, #tpu.memory_space<vmem>>, vector<16x160xbf16>
    %c0_43 = arith.constant 0 : index
    %c0_44 = arith.constant 0 : index
    %71 = vector.load %arg7[%c0_43, %c0_44] : memref<160x256xbf16, #tpu.memory_space<vmem>>, vector<160x256xbf16>
    %cst_45 = arith.constant dense<0.000000e+00> : vector<16x256xf32>
    %72 = tpu.matmul %70, %71, %cst_45 {dimension_numbers = #tpu.dot_dimension_numbers<[1], [0], [0], [1], [0, 0, 1, 1], [], []>} : vector<16x160xbf16>, vector<160x256xbf16>, vector<16x256xf32> -> vector<16x256xf32>
    %cst_46 = arith.constant 0.000000e+00 : f32
    %73 = vector.broadcast %cst_46 : f32 to vector<16x256xf32>
    %74 = arith.maximumf %72, %73 : vector<16x256xf32>
    %75 = vector.broadcast %0 : vector<1x256xf32> to vector<16x256xf32>
    %76 = arith.mulf %74, %75 : vector<16x256xf32>
    %c11_i32_47 = arith.constant 11 : i32
    %77 = tpu.dynamic_rotate %76 by %c11_i32_47 dim 1 : vector<16x256xf32>, i32 -> vector<16x256xf32>
    %78 = arith.truncf %77 : vector<16x256xf32> to vector<16x256xbf16>
    %c0_48 = arith.constant 0 : index
    %c0_49 = arith.constant 0 : index
    %79 = vector.load %arg7[%c0_48, %c0_49] : memref<160x256xbf16, #tpu.memory_space<vmem>>, vector<16x256xbf16>
    tpu.vector_store %arg7[%c0_48, %c0_49], %78 {strides = array<i32>} : memref<160x256xbf16, #tpu.memory_space<vmem>>, vector<16x256xbf16>,
    %c10_i32_50 = arith.constant 10 : i32
    %80 = tpu.dynamic_rotate %76 by %c10_i32_50 dim 1 : vector<16x256xf32>, i32 -> vector<16x256xf32>
    %81 = arith.truncf %80 : vector<16x256xf32> to vector<16x256xbf16>
    %c16_51 = arith.constant 16 : index
    %c0_52 = arith.constant 0 : index
    %82 = vector.load %arg7[%c16_51, %c0_52] : memref<160x256xbf16, #tpu.memory_space<vmem>>, vector<16x256xbf16>
    tpu.vector_store %arg7[%c16_51, %c0_52], %81 {strides = array<i32>} : memref<160x256xbf16, #tpu.memory_space<vmem>>, vector<16x256xbf16>,
    %c9_i32_53 = arith.constant 9 : i32
    %83 = tpu.dynamic_rotate %76 by %c9_i32_53 dim 1 : vector<16x256xf32>, i32 -> vector<16x256xf32>
    %84 = arith.truncf %83 : vector<16x256xf32> to vector<16x256xbf16>
    %c32_54 = arith.constant 32 : index
    %c0_55 = arith.constant 0 : index
    %85 = vector.load %arg7[%c32_54, %c0_55] : memref<160x256xbf16, #tpu.memory_space<vmem>>, vector<16x256xbf16>
    tpu.vector_store %arg7[%c32_54, %c0_55], %84 {strides = array<i32>} : memref<160x256xbf16, #tpu.memory_space<vmem>>, vector<16x256xbf16>,
    %c1_i32_56 = arith.constant 1 : i32
    %86 = tpu.dynamic_rotate %76 by %c1_i32_56 dim 1 : vector<16x256xf32>, i32 -> vector<16x256xf32>
    %87 = arith.truncf %86 : vector<16x256xf32> to vector<16x256xbf16>
    %c48_57 = arith.constant 48 : index
    %c0_58 = arith.constant 0 : index
    %88 = vector.load %arg7[%c48_57, %c0_58] : memref<160x256xbf16, #tpu.memory_space<vmem>>, vector<16x256xbf16>
    tpu.vector_store %arg7[%c48_57, %c0_58], %87 {strides = array<i32>} : memref<160x256xbf16, #tpu.memory_space<vmem>>, vector<16x256xbf16>,
    %89 = arith.truncf %76 : vector<16x256xf32> to vector<16x256xbf16>
    %c64_59 = arith.constant 64 : index
    %c0_60 = arith.constant 0 : index
    %90 = vector.load %arg7[%c64_59, %c0_60] : memref<160x256xbf16, #tpu.memory_space<vmem>>, vector<16x256xbf16>
    tpu.vector_store %arg7[%c64_59, %c0_60], %89 {strides = array<i32>} : memref<160x256xbf16, #tpu.memory_space<vmem>>, vector<16x256xbf16>,
    %c255_i32_61 = arith.constant 255 : i32
    %91 = tpu.dynamic_rotate %76 by %c255_i32_61 dim 1 : vector<16x256xf32>, i32 -> vector<16x256xf32>
    %92 = arith.truncf %91 : vector<16x256xf32> to vector<16x256xbf16>
    %c80_62 = arith.constant 80 : index
    %c0_63 = arith.constant 0 : index
    %93 = vector.load %arg7[%c80_62, %c0_63] : memref<160x256xbf16, #tpu.memory_space<vmem>>, vector<16x256xbf16>
    tpu.vector_store %arg7[%c80_62, %c0_63], %92 {strides = array<i32>} : memref<160x256xbf16, #tpu.memory_space<vmem>>, vector<16x256xbf16>,
    %c247_i32_64 = arith.constant 247 : i32
    %94 = tpu.dynamic_rotate %76 by %c247_i32_64 dim 1 : vector<16x256xf32>, i32 -> vector<16x256xf32>
    %95 = arith.truncf %94 : vector<16x256xf32> to vector<16x256xbf16>
    %c96_65 = arith.constant 96 : index
    %c0_66 = arith.constant 0 : index
    %96 = vector.load %arg7[%c96_65, %c0_66] : memref<160x256xbf16, #tpu.memory_space<vmem>>, vector<16x256xbf16>
    tpu.vector_store %arg7[%c96_65, %c0_66], %95 {strides = array<i32>} : memref<160x256xbf16, #tpu.memory_space<vmem>>, vector<16x256xbf16>,
    %c246_i32_67 = arith.constant 246 : i32
    %97 = tpu.dynamic_rotate %76 by %c246_i32_67 dim 1 : vector<16x256xf32>, i32 -> vector<16x256xf32>
    %98 = arith.truncf %97 : vector<16x256xf32> to vector<16x256xbf16>
    %c112_68 = arith.constant 112 : index
    %c0_69 = arith.constant 0 : index
    %99 = vector.load %arg7[%c112_68, %c0_69] : memref<160x256xbf16, #tpu.memory_space<vmem>>, vector<16x256xbf16>
    tpu.vector_store %arg7[%c112_68, %c0_69], %98 {strides = array<i32>} : memref<160x256xbf16, #tpu.memory_space<vmem>>, vector<16x256xbf16>,
    %c245_i32_70 = arith.constant 245 : i32
    %100 = tpu.dynamic_rotate %76 by %c245_i32_70 dim 1 : vector<16x256xf32>, i32 -> vector<16x256xf32>
    %101 = arith.truncf %100 : vector<16x256xf32> to vector<16x256xbf16>
    %c128_71 = arith.constant 128 : index
    %c0_72 = arith.constant 0 : index
    %102 = vector.load %arg7[%c128_71, %c0_72] : memref<160x256xbf16, #tpu.memory_space<vmem>>, vector<16x256xbf16>
    tpu.vector_store %arg7[%c128_71, %c0_72], %101 {strides = array<i32>} : memref<160x256xbf16, #tpu.memory_space<vmem>>, vector<16x256xbf16>,
    %c0_73 = arith.constant 0 : index
    %c0_74 = arith.constant 0 : index
    %103 = vector.load %arg4[%c0_73, %c0_74] : memref<8x160xbf16, #tpu.memory_space<vmem>>, vector<8x160xbf16>
    %c0_75 = arith.constant 0 : index
    %c0_76 = arith.constant 0 : index
    %104 = vector.load %arg7[%c0_75, %c0_76] : memref<160x256xbf16, #tpu.memory_space<vmem>>, vector<160x256xbf16>
    %cst_77 = arith.constant dense<0.000000e+00> : vector<8x256xf32>
    %105 = tpu.matmul %103, %104, %cst_77 {dimension_numbers = #tpu.dot_dimension_numbers<[1], [0], [0], [1], [0, 0, 1, 1], [], []>} : vector<8x160xbf16>, vector<160x256xbf16>, vector<8x256xf32> -> vector<8x256xf32>
    %cst_78 = arith.constant 0.000000e+00 : f32
    %106 = vector.broadcast %cst_78 : f32 to vector<8x256xf32>
    %107 = arith.maximumf %105, %106 : vector<8x256xf32>
    %108 = vector.broadcast %0 : vector<1x256xf32> to vector<8x256xf32>
    %109 = arith.mulf %107, %108 : vector<8x256xf32>
    %c0_79 = arith.constant 0 : index
    %c0_80 = arith.constant 0 : index
    %110 = vector.load %arg6[%c0_79, %c0_80] : memref<8x256xf32, #tpu.memory_space<vmem>>, vector<8x256xf32>
    tpu.vector_store %arg6[%c0_79, %c0_80], %109 {strides = array<i32>} : memref<8x256xf32, #tpu.memory_space<vmem>>, vector<8x256xf32>,
    return
  }
  func.func @transform_0(%arg0: i32) -> (i32, i32) {
    %c0_i32 = arith.constant 0 : i32
    %c0_i32_0 = arith.constant 0 : i32
    %c0_i32_1 = arith.constant 0 : i32
    return %c0_i32, %c0_i32_0 : i32, i32
  }
  func.func @transform_1(%arg0: i32) -> (i32, i32) {
    %c0_i32 = arith.constant 0 : i32
    %c0_i32_0 = arith.constant 0 : i32
    %c0_i32_1 = arith.constant 0 : i32
    return %c0_i32, %c0_i32_0 : i32, i32
  }
  func.func @transform_2(%arg0: i32) -> (i32, i32) {
    %c0_i32 = arith.constant 0 : i32
    %c0_i32_0 = arith.constant 0 : i32
    %c0_i32_1 = arith.constant 0 : i32
    return %c0_i32, %c0_i32_0 : i32, i32
  }
  func.func @transform_3(%arg0: i32) -> (i32, i32) {
    %c0_i32 = arith.constant 0 : i32
    %c0_i32_0 = arith.constant 0 : i32
    %c0_i32_1 = arith.constant 0 : i32
    return %c0_i32, %c0_i32_0 : i32, i32
  }
  func.func @transform_4(%arg0: i32) -> (i32, i32) {
    %c0_i32 = arith.constant 0 : i32
    %c0_i32_0 = arith.constant 0 : i32
    %c0_i32_1 = arith.constant 0 : i32
    return %c0_i32, %c0_i32_0 : i32, i32
  }
  func.func @transform_5(%arg0: i32) -> (i32, i32) {
    %c0_i32 = arith.constant 0 : i32
    %c0_i32_0 = arith.constant 0 : i32
    %c0_i32_1 = arith.constant 0 : i32
    return %c0_i32, %c0_i32_0 : i32, i32
  }
}

</mosaic_0001>

<bundles_post_ra>
// kernel: encoder_forward.1
= control target key start
LH: loop header
LB: loop body
LE: loop exit
PB: predicated region body
PF: predicated region fallthrough
CT: control target
= control target key end

     0   :  { %s1076_s26 = smov 126   ;;  %s1077_s27 = smov 127   ;;  %vm235_vm0 = vcmask 261120   ;;  %v41_v9 = vlaneseq  ;;  %s1465_s0 = inlined_call_operand.vmem [shape: f32[16,256], index: 0, kind: input, shape index: {}]   ;;  %s1466_s1 = inlined_call_operand.vmem [shape: bf16[64,160], index: 1, kind: input, shape index: {}]   ;;  %s1467_s4 = inlined_call_operand.vmem [shape: f32[1,256], index: 4, kind: input, shape index: {}]   ;;  %s1468_s2 = inlined_call_operand.vmem [shape: bf16[16,160], index: 2, kind: input, shape index: {}]   ;;  %s1469_s3 = inlined_call_operand.vmem [shape: bf16[8,160], index: 3, kind: input, shape index: {}]   ;;  %s1470_s5 = inlined_call_operand.vmem [shape: f32[8,256], index: 5, kind: output, shape index: {}]  }
   0x1   :  { %v25_v0 = vld [vmem:[%s1465_s0] sm:$0xff]  ;;  %v27_v1 = vld [vmem:[%s1465_s0 + $0x10] sm:$0xff]  ;;  %v26_v2 = vld [vmem:[%s1465_s0 + $0x8] sm:$0xff]  ;;  %s1078_s28 = smov 118   ;;  %s1079_s29 = smov 117  }
   0x2   :  { %v829_v3 = vpack.i.bf16 %v27_v1, %v25_v0  ;;  %v28_v4 = vld [vmem:[%s1465_s0 + $0x18] sm:$0xff]  ;;  %v29_v7 = vpack.c.bf16 %v27_v1, %v25_v0  ;;  %s1080_s0 = smov 116   ;;  %s1081_s30 = smov 108   ;;  %v1061_v8 = vld [vmem:[%s1466_s1 + $0x4] ss:$8 sps:$4 sm:$0xff]   ;;  %v1143_v10 = vand.u32 127, %v41_v9 }
   0x3   :  { %v834_v5 = vpack.i.bf16 %v28_v4, %v26_v2  ;;  %v30_v6 = vpack.c.bf16 %v28_v4, %v26_v2  ;;  %s1082_s6 = smov 107   ;;  %s1083_s7 = smov 106   ;;  %795 = vmatprep.mubr.msk.bf16.mxu0 %vm235_vm0, %v1061_v8 }
   0x4   :  { %830 = vrot.lane.b32.xlu1 %v829_v3, %s1076_s26  ;;  %820 = vrot.lane.b32.xlu0 %v829_v3, %s1077_s27  ;;  %vm43_vm1 = vcmp.lt.s32.totalorder %v1143_v10, 127  ;;  %vm60_vm2 = vcmp.lt.s32.totalorder %v1143_v10, 126  ;;  %vm77_vm3 = vcmp.lt.s32.totalorder %v1143_v10, 118  ;;  %vm94_vm4 = vcmp.lt.s32.totalorder %v1143_v10, 117  ;;  %s1086_s25 = smov 10  }
   0x5   :  { %248 = vmatprep.subr.bf16.mxu0 %v30_v6  ;;  %vm111_vm5 = vcmp.lt.s32.totalorder %v1143_v10, 116  ;;  %vm128_vm6 = vcmp.lt.s32.totalorder %v1143_v10, 108  ;;  %vm145_vm7 = vcmp.lt.s32.totalorder %v1143_v10, 107  ;;  %vm162_vm8 = vcmp.lt.s32.totalorder %v1143_v10, 106 }
   0x6   :  { %249 = vmatpush1.bf16.msra.mxu0 %v29_v7  ;;  %vm360_vm9 = vcmp.lt.s32.totalorder %v1143_v10, 11  ;;  %vm377_vm10 = vcmp.lt.s32.totalorder %v1143_v10, 10  ;;  %vm394_vm11 = vcmp.lt.s32.totalorder %v1143_v10, 9  ;;  %vm411_vm12 = vcmp.lt.s32.totalorder %v1143_v10, 1 }
   0x7   :  { %vm448_vm13 = vcmp.lt.s32.totalorder %v1143_v10, 119 }
   0x8   :  { %835 = vrot.lane.b32.xlu1 %v834_v5, %s1076_s26  ;;  %825 = vrot.lane.b32.xlu0 %v834_v5, %s1077_s27  ;;  %s1087_s26 = smov 9  }
   0xc   :  { %845 = vrot.lane.b32.xlu1 %v834_v5, %s1078_s28  ;;  %840 = vrot.lane.b32.xlu0 %v829_v3, %s1078_s28 }
  0x10   :  { %855 = vrot.lane.b32.xlu1 %v834_v5, %s1079_s29  ;;  %850 = vrot.lane.b32.xlu0 %v829_v3, %s1079_s29 }
  0x14   :  { %865 = vrot.lane.b32.xlu1 %v834_v5, %s1080_s0  ;;  %860 = vrot.lane.b32.xlu0 %v829_v3, %s1080_s0  ;;  %s1088_s0 = smov 1  }
  0x18   :  { %875 = vrot.lane.b32.xlu1 %v834_v5, %s1081_s30  ;;  %870 = vrot.lane.b32.xlu0 %v829_v3, %s1081_s30  ;;  %s1089_s30 = smov 119  }
  0x1c   :  { %885 = vrot.lane.b32.xlu1 %v834_v5, %s1082_s6  ;;  %880 = vrot.lane.b32.xlu0 %v829_v3, %s1082_s6 }
  0x20   :  { %895 = vrot.lane.b32.xlu1 %v834_v5, %s1083_s7  ;;  %890 = vrot.lane.b32.xlu0 %v829_v3, %s1083_s7 }
  0x76   :  { %v831_v11 = vpop.permute.xlu1 %830  ;;  %v821_v12 = vpop.permute.xlu0 %820 }
  0x77   :  { %v833_v13 = vunpack.i.h.bf16 %v831_v11  ;;  %v832_v14 = vunpack.i.l.bf16 %v831_v11  ;;  %v823_v15 = vunpack.i.h.bf16 %v821_v12  ;;  %v822_v16 = vunpack.i.l.bf16 %v821_v12 }
  0x7a   :  { %v836_v17 = vpop.permute.xlu1 %835  ;;  %v826_v18 = vpop.permute.xlu0 %825 }
  0x7b   :  { %v838_v19 = vunpack.i.h.bf16 %v836_v17  ;;  %v837_v20 = vunpack.i.l.bf16 %v836_v17  ;;  %v828_v21 = vunpack.i.h.bf16 %v826_v18  ;;  %v827_v22 = vunpack.i.l.bf16 %v826_v18 }
  0x7d   :  { %v46_v23 = vsel %vm43_vm1, %v827_v22, %v822_v16  ;;  %v47_v24 = vsel %vm43_vm1, %v828_v21, %v823_v15  ;;  %v44_v25 = vsel %vm43_vm1, %v822_v16, %v827_v22  ;;  %v45_v26 = vsel %vm43_vm1, %v823_v15, %v828_v21 }
  0x7e   :  { %v49_v27 = vpack.c.bf16 %v47_v24, %v46_v23  ;;  %v48_v28 = vpack.c.bf16 %v45_v26, %v44_v25  ;;  %v846_v29 = vpop.permute.xlu1 %845  ;;  %v841_v30 = vpop.permute.xlu0 %840  ;;  %v63_v31 = vsel %vm60_vm2, %v837_v20, %v832_v14  ;;  %v64_v32 = vsel %vm60_vm2, %v838_v19, %v833_v13 }
  0x7f   :  { %v848_v33 = vunpack.i.h.bf16 %v846_v29  ;;  %v847_v34 = vunpack.i.l.bf16 %v846_v29  ;;  %v843_v35 = vunpack.i.h.bf16 %v841_v30  ;;  %v842_v36 = vunpack.i.l.bf16 %v841_v30 }
  0x80   :  { %250 = vmatprep.subr.bf16.mxu0 %v49_v27  ;;  %v66_v37 = vpack.c.bf16 %v64_v32, %v63_v31  ;;  %v61_v38 = vsel %vm60_vm2, %v832_v14, %v837_v20  ;;  %v62_v39 = vsel %vm60_vm2, %v833_v13, %v838_v19 }
  0x81   :  { %251 = vmatpush1.bf16.msra.mxu0 %v48_v28  ;;  %v80_v40 = vsel %vm77_vm3, %v847_v34, %v842_v36  ;;  %v81_v41 = vsel %vm77_vm3, %v848_v33, %v843_v35  ;;  %v65_v42 = vpack.c.bf16 %v62_v39, %v61_v38  ;;  %v78_v46 = vsel %vm77_vm3, %v842_v36, %v847_v34 }
  0x82   :  { %252 = vmatprep.subr.bf16.mxu0 %v66_v37  ;;  %v856_v43 = vpop.permute.xlu1 %855  ;;  %v851_v44 = vpop.permute.xlu0 %850  ;;  %v83_v45 = vpack.c.bf16 %v81_v41, %v80_v40  ;;  %v79_v47 = vsel %vm77_vm3, %v843_v35, %v848_v33 }
  0x83   :  { %v858_v48 = vunpack.i.h.bf16 %v856_v43  ;;  %v857_v49 = vunpack.i.l.bf16 %v856_v43  ;;  %v853_v50 = vunpack.i.h.bf16 %v851_v44  ;;  %v852_v51 = vunpack.i.l.bf16 %v851_v44 }
  0x84   :  { %v82_v52 = vpack.c.bf16 %v79_v47, %v78_v46  ;;  %v1059_v46 = vld [vmem:[%s1466_s1] ss:$8 sps:$4 sm:$0xff]   ;;  %v1062_v47 = vld [vmem:[%s1466_s1 + $0x14] ss:$8 sps:$4 sm:$0xff]  }
  0x85   :  { %253 = vmatpush1.bf16.msra.mxu0 %v65_v42  ;;  %v97_v53 = vsel %vm94_vm4, %v857_v49, %v852_v51  ;;  %v98_v54 = vsel %vm94_vm4, %v858_v48, %v853_v50  ;;  %v95_v58 = vsel %vm94_vm4, %v852_v51, %v857_v49  ;;  %v96_v59 = vsel %vm94_vm4, %v853_v50, %v858_v48  ;;  %v1064_v48 = vld [vmem:[%s1466_s1 + $0x10] ss:$8 sps:$4 sm:$0xff]   ;;  %v1065_v49 = vld [vmem:[%s1466_s1 + $0x24] ss:$8 sps:$4 sm:$0xff]   ;;  %v1067_v50 = vld [vmem:[%s1466_s1 + $0x20] ss:$8 sps:$4 sm:$0xff]  }
  0x86   :  { %254 = vmatprep.subr.bf16.mxu0 %v83_v45  ;;  %v866_v55 = vpop.permute.xlu1 %865  ;;  %v861_v56 = vpop.permute.xlu0 %860  ;;  %v100_v57 = vpack.c.bf16 %v98_v54, %v97_v53  ;;  %v99_v0 = vpack.c.bf16 %v96_v59, %v95_v58  ;;  %v1084_v45 = vmov 1065369472   ;;  %v1068_v51 = vld [vmem:[%s1466_s1 + $0x34] ss:$8 sps:$4 sm:$0xff]  }
  0x87   :  { %v868_v60 = vunpack.i.h.bf16 %v866_v55  ;;  %v867_v61 = vunpack.i.l.bf16 %v866_v55  ;;  %v863_v62 = vunpack.i.h.bf16 %v861_v56  ;;  %v862_v63 = vunpack.i.l.bf16 %v861_v56 }
  0x89   :  { %255 = vmatpush1.bf16.msra.mxu0 %v82_v52  ;;  %v114_v1 = vsel %vm111_vm5, %v867_v61, %v862_v63  ;;  %v115_v2 = vsel %vm111_vm5, %v868_v60, %v863_v62  ;;  %v112_v6 = vsel %vm111_vm5, %v862_v63, %v867_v61  ;;  %v113_v7 = vsel %vm111_vm5, %v863_v62, %v868_v60  ;;  %v1070_v52 = vld [vmem:[%s1466_s1 + $0x30] ss:$8 sps:$4 sm:$0xff]  }
  0x8a   :  { %256 = vmatprep.subr.bf16.mxu0 %v100_v57  ;;  %v876_v3 = vpop.permute.xlu1 %875  ;;  %v871_v4 = vpop.permute.xlu0 %870  ;;  %v117_v5 = vpack.c.bf16 %v115_v2, %v114_v1  ;;  %v116_v14 = vpack.c.bf16 %v113_v7, %v112_v6 }
  0x8b   :  { %v878_v8 = vunpack.i.h.bf16 %v876_v3  ;;  %v877_v11 = vunpack.i.l.bf16 %v876_v3  ;;  %v873_v12 = vunpack.i.h.bf16 %v871_v4  ;;  %v872_v13 = vunpack.i.l.bf16 %v871_v4 }
  0x8d   :  { %257 = vmatpush1.bf16.msra.mxu0 %v99_v0  ;;  %v131_v15 = vsel %vm128_vm6, %v877_v11, %v872_v13  ;;  %v132_v16 = vsel %vm128_vm6, %v878_v8, %v873_v12  ;;  %v129_v20 = vsel %vm128_vm6, %v872_v13, %v877_v11  ;;  %v130_v21 = vsel %vm128_vm6, %v873_v12, %v878_v8  ;;  %v22_v12 = vld [vmem:[%s1467_s4] sm:$0x3]  ;;  %s1085_s4 = smov 11  }
  0x8e   :  { %258 = vmatprep.subr.bf16.mxu0 %v117_v5  ;;  %v886_v17 = vpop.permute.xlu1 %885  ;;  %v881_v18 = vpop.permute.xlu0 %880  ;;  %v134_v19 = vpack.c.bf16 %v132_v16, %v131_v15  ;;  %v133_v26 = vpack.c.bf16 %v130_v21, %v129_v20  ;;  %v339_v5 = vshrl.u32 %v41_v9, 7 }
  0x8f   :  { %v888_v22 = vunpack.i.h.bf16 %v886_v17  ;;  %v887_v23 = vunpack.i.l.bf16 %v886_v17  ;;  %v883_v24 = vunpack.i.h.bf16 %v881_v18  ;;  %v882_v25 = vunpack.i.l.bf16 %v881_v18 }
  0x90   :  { %v340_v8 = vsub.s32 0, %v339_v5 }
  0x91   :  { %259 = vmatpush1.bf16.msra.mxu0 %v116_v14  ;;  %v148_v27 = vsel %vm145_vm7, %v887_v23, %v882_v25  ;;  %v149_v28 = vsel %vm145_vm7, %v888_v22, %v883_v24  ;;  %v146_v32 = vsel %vm145_vm7, %v882_v25, %v887_v23  ;;  %v147_v33 = vsel %vm145_vm7, %v883_v24, %v888_v22 }
  0x92   :  { %260 = vmatprep.subr.bf16.mxu0 %v134_v19  ;;  %v896_v29 = vpop.permute.xlu1 %895  ;;  %v891_v30 = vpop.permute.xlu0 %890  ;;  %v151_v31 = vpack.c.bf16 %v149_v28, %v148_v27  ;;  %v150_v38 = vpack.c.bf16 %v147_v33, %v146_v32  ;;  %v344_v14 = vsub.s32 1, %v339_v5  ;;  %v1215_v22 = vrot.slane %v22_v12, %v340_v8 }
  0x93   :  { %v898_v34 = vunpack.i.h.bf16 %v896_v29  ;;  %v897_v35 = vunpack.i.l.bf16 %v896_v29  ;;  %v893_v36 = vunpack.i.h.bf16 %v891_v30  ;;  %v892_v37 = vunpack.i.l.bf16 %v891_v30 }
  0x94   :  { %v1217_v24 = vrot.slane %v22_v12, %v344_v14 }
  0x95   :  { %261 = vmatpush1.bf16.msra.mxu0 %v133_v26  ;;  %v165_v39 = vsel %vm162_vm8, %v897_v35, %v892_v37  ;;  %v166_v40 = vsel %vm162_vm8, %v898_v34, %v893_v36  ;;  %v163_v42 = vsel %vm162_vm8, %v892_v37, %v897_v35  ;;  %v164_v43 = vsel %vm162_vm8, %v893_v36, %v898_v34  ;;  %v1073_v36 = vld [vmem:[%s1468_s2 + $0x4] ss:$8 sps:$4 sm:$0xff]  }
  0x96   :  { %262 = vmatprep.subr.bf16.mxu0 %v151_v31  ;;  %v168_v41 = vpack.c.bf16 %v166_v40, %v165_v39  ;;  %v167_v44 = vpack.c.bf16 %v164_v43, %v163_v42  ;;  %801 = vmatprep.mubr.msk.bf16.mxu1 %vm235_vm0, %v1073_v36 }
  0x99   :  { %263 = vmatpush1.bf16.msra.mxu0 %v150_v38 }
  0x9a   :  { %264 = vmatprep.subr.bf16.mxu0 %v168_v41 }
  0x9d   :  { %265 = vmatpush1.bf16.msra.mxu0 %v167_v44 }
  0x9e   :  { %266 = vmatprep.subr.bf16.mxu0 %v1084_v45 }
  0xa1   :  { %267 = vmatpush1.bf16.msra.mxu0 %v1084_v45 }
  0xa4   :  { %281 = vmatmul.mubr.bf16.vlgmr.msra.gmra.mrb[0].mxu0 %v1059_v46 }
  0xa5   :  { %796 = vmatprep.mubr.msk.bf16.mxu0 %vm235_vm0, %v1062_v47 }
  0xac   :  { %291 = vmatmul.mubr.bf16.gmra.mrb[4].mxu0 %v1064_v48 }
  0xad   :  { %797 = vmatprep.mubr.msk.bf16.mxu0 %vm235_vm0, %v1065_v49 }
  0xb4   :  { %301 = vmatmul.mubr.bf16.gmra.mrb[8].mxu0 %v1067_v50 }
  0xb5   :  { %798 = vmatprep.mubr.msk.bf16.mxu0 %vm235_vm0, %v1068_v51 }
  0xbc   :  { %311 = vmatmul.mubr.bf16.gmra.mrb[12].mxu0 %v1070_v52 }
 0x177   :  { %v282_v53 = vpop.f32.mrb[0].mxu0 }
 0x178   :  { %v284_v54 = vpop.f32.mrb[1].mxu0 }
 0x179   :  { %v286_v55 = vpop.f32.mrb[2].mxu0 }
 0x17a   :  { %v288_v56 = vpop.f32.mrb[3].mxu0 }
 0x17f   :  { %v292_v57 = vpop.f32.mrb[4].mxu0 }
 0x180   :  { %v321_v58 = vmax.f32 %v282_v53, %v292_v57  ;;  %v294_v59 = vpop.f32.mrb[5].mxu0 }
 0x181   :  { %v322_v60 = vmax.f32 %v284_v54, %v294_v59  ;;  %v296_v61 = vpop.f32.mrb[6].mxu0 }
 0x182   :  { %v323_v62 = vmax.f32 %v286_v55, %v296_v61  ;;  %v298_v63 = vpop.f32.mrb[7].mxu0 }
 0x183   :  { %v324_v0 = vmax.f32 %v288_v56, %v298_v63 }
 0x187   :  { %v302_v1 = vpop.f32.mrb[8].mxu0 }
 0x188   :  { %v304_v2 = vpop.f32.mrb[9].mxu0 }
 0x189   :  { %v306_v3 = vpop.f32.mrb[10].mxu0 }
 0x18a   :  { %v308_v4 = vpop.f32.mrb[11].mxu0 }
 0x18f   :  { %v312_v6 = vpop.f32.mrb[12].mxu0 }
 0x190   :  { %v325_v7 = vmax.f32 %v302_v1, %v312_v6  ;;  %v314_v11 = vpop.f32.mrb[13].mxu0 }
 0x191   :  { %v326_v13 = vmax.f32 %v304_v2, %v314_v11  ;;  %v316_v15 = vpop.f32.mrb[14].mxu0 }
 0x192   :  { %v329_v16 = vmax.f32 %v321_v58, %v325_v7  ;;  %v327_v17 = vmax.f32 %v306_v3, %v316_v15  ;;  %v318_v18 = vpop.f32.mrb[15].mxu0 }
 0x193   :  { %v330_v19 = vmax.f32 %v322_v60, %v326_v13  ;;  %v328_v20 = vmax.f32 %v308_v4, %v318_v18 }
 0x194   :  { %v333_v21 = vmax.f32 %v329_v16, 0.0  ;;  %v331_v9 = vmax.f32 %v323_v62, %v327_v17 }
 0x195   :  { %v334_v23 = vmax.f32 %v330_v19, 0.0  ;;  %v332_v25 = vmax.f32 %v324_v0, %v328_v20 }
 0x196   :  { %v335_v26 = vmax.f32 %v331_v9, 0.0  ;;  %v1220_v28 = vmul.f32 %v1215_v22, %v333_v21 }
 0x197   :  { %v336_v27 = vmax.f32 %v332_v25, 0.0  ;;  %v1226_v30 = vmul.f32 %v1217_v24, %v334_v23 }
 0x198   :  { %v1223_v29 = vmul.f32 %v1215_v22, %v335_v26 }
 0x199   :  { %v1229_v31 = vmul.f32 %v1217_v24, %v336_v27 }
 0x19a   :  { %v899_v32 = vpack.i.bf16 %v1223_v29, %v1220_v28  ;;  %v420_v35 = vpack.c.bf16 %v1223_v29, %v1220_v28 }
 0x19b   :  { %v919_v33 = vpack.i.bf16 %v1229_v31, %v1226_v30  ;;  %v421_v34 = vpack.c.bf16 %v1229_v31, %v1226_v30 }
 0x19c   :  { %900 = vrot.lane.b32.xlu0 %v899_v32, %s1085_s4 }
 0x19d   :  { %920 = vrot.lane.b32.xlu1 %v919_v33, %s1085_s4 }
 0x1a0   :  { %905 = vrot.lane.b32.xlu0 %v899_v32, %s1086_s25 }
 0x1a1   :  { %925 = vrot.lane.b32.xlu1 %v919_v33, %s1086_s25 }
 0x1a4   :  { %910 = vrot.lane.b32.xlu0 %v899_v32, %s1087_s26 }
 0x1a5   :  { %930 = vrot.lane.b32.xlu1 %v919_v33, %s1087_s26 }
 0x1a8   :  { %915 = vrot.lane.b32.xlu0 %v899_v32, %s1088_s0 }
 0x1a9   :  { %935 = vrot.lane.b32.xlu1 %v919_v33, %s1088_s0 }
 0x1ac   :  { %940 = vrot.lane.b32.xlu0 %v899_v32, %s1077_s27 }
 0x1ad   :  { %960 = vrot.lane.b32.xlu1 %v919_v33, %s1077_s27 }
 0x1b0   :  { %945 = vrot.lane.b32.xlu0 %v899_v32, %s1089_s30 }
 0x1b1   :  { %965 = vrot.lane.b32.xlu1 %v919_v33, %s1089_s30 }
 0x1b4   :  { %950 = vrot.lane.b32.xlu0 %v899_v32, %s1078_s28 }
 0x1b5   :  { %970 = vrot.lane.b32.xlu1 %v919_v33, %s1078_s28 }
 0x1b8   :  { %955 = vrot.lane.b32.xlu0 %v899_v32, %s1079_s29 }
 0x1b9   :  { %975 = vrot.lane.b32.xlu1 %v919_v33, %s1079_s29 }
 0x20e   :  { %v901_v37 = vpop.permute.xlu0 %900 }
 0x20f   :  { %v903_v38 = vunpack.i.h.bf16 %v901_v37  ;;  %v902_v39 = vunpack.i.l.bf16 %v901_v37  ;;  %v921_v40 = vpop.permute.xlu1 %920 }
 0x210   :  { %v923_v41 = vunpack.i.h.bf16 %v921_v40  ;;  %v922_v42 = vunpack.i.l.bf16 %v921_v40 }
 0x212   :  { %v906_v43 = vpop.permute.xlu0 %905  ;;  %v361_v44 = vsel %vm360_vm9, %v902_v39, %v922_v42  ;;  %v362_v46 = vsel %vm360_vm9, %v903_v38, %v923_v41  ;;  %v363_v47 = vsel %vm360_vm9, %v922_v42, %v902_v39  ;;  %v364_v48 = vsel %vm360_vm9, %v923_v41, %v903_v38 }
 0x213   :  { %v908_v49 = vunpack.i.h.bf16 %v906_v43  ;;  %v907_v50 = vunpack.i.l.bf16 %v906_v43  ;;  %v926_v51 = vpop.permute.xlu1 %925  ;;  %v366_v52 = vpack.c.bf16 %v362_v46, %v361_v44  ;;  %v365_v53 = vpack.c.bf16 %v364_v48, %v363_v47 }
 0x214   :  { %v928_v54 = vunpack.i.h.bf16 %v926_v51  ;;  %v927_v55 = vunpack.i.l.bf16 %v926_v51 }
 0x215   :  { %523 = vmatprep.subr.bf16.mxu1 %v366_v52 }
 0x216   :  { %v911_v56 = vpop.permute.xlu0 %910  ;;  %524 = vmatpush1.bf16.msra.mxu1 %v365_v53  ;;  %v378_v57 = vsel %vm377_vm10, %v907_v50, %v927_v55  ;;  %v379_v58 = vsel %vm377_vm10, %v908_v49, %v928_v54  ;;  %v380_v59 = vsel %vm377_vm10, %v927_v55, %v907_v50  ;;  %v381_v60 = vsel %vm377_vm10, %v928_v54, %v908_v49 }
 0x217   :  { %v913_v61 = vunpack.i.h.bf16 %v911_v56  ;;  %v912_v62 = vunpack.i.l.bf16 %v911_v56  ;;  %v931_v63 = vpop.permute.xlu1 %930  ;;  %v383_v0 = vpack.c.bf16 %v379_v58, %v378_v57  ;;  %v382_v1 = vpack.c.bf16 %v381_v60, %v380_v59 }
 0x218   :  { %v933_v2 = vunpack.i.h.bf16 %v931_v63  ;;  %v932_v3 = vunpack.i.l.bf16 %v931_v63 }
 0x219   :  { %525 = vmatprep.subr.bf16.mxu1 %v383_v0 }
 0x21a   :  { %v916_v4 = vpop.permute.xlu0 %915  ;;  %526 = vmatpush1.bf16.msra.mxu1 %v382_v1  ;;  %v395_v5 = vsel %vm394_vm11, %v912_v62, %v932_v3  ;;  %v396_v6 = vsel %vm394_vm11, %v913_v61, %v933_v2  ;;  %v397_v7 = vsel %vm394_vm11, %v932_v3, %v912_v62  ;;  %v398_v8 = vsel %vm394_vm11, %v933_v2, %v913_v61 }
 0x21b   :  { %v918_v11 = vunpack.i.h.bf16 %v916_v4  ;;  %v917_v12 = vunpack.i.l.bf16 %v916_v4  ;;  %v936_v13 = vpop.permute.xlu1 %935  ;;  %v400_v14 = vpack.c.bf16 %v396_v6, %v395_v5  ;;  %v399_v15 = vpack.c.bf16 %v398_v8, %v397_v7 }
 0x21c   :  { %v938_v16 = vunpack.i.h.bf16 %v936_v13  ;;  %v937_v17 = vunpack.i.l.bf16 %v936_v13 }
 0x21d   :  { %527 = vmatprep.subr.bf16.mxu1 %v400_v14 }
 0x21e   :  { %v941_v18 = vpop.permute.xlu0 %940  ;;  %528 = vmatpush1.bf16.msra.mxu1 %v399_v15  ;;  %v412_v19 = vsel %vm411_vm12, %v917_v12, %v937_v17  ;;  %v413_v20 = vsel %vm411_vm12, %v918_v11, %v938_v16  ;;  %v414_v21 = vsel %vm411_vm12, %v937_v17, %v917_v12  ;;  %v415_v9 = vsel %vm411_vm12, %v938_v16, %v918_v11  ;;  %v1071_v12 = vld [vmem:[%s1468_s2] ss:$8 sps:$4 sm:$0xff]  }
 0x21f   :  { %v943_v23 = vunpack.i.h.bf16 %v941_v18  ;;  %v942_v25 = vunpack.i.l.bf16 %v941_v18  ;;  %v961_v26 = vpop.permute.xlu1 %960  ;;  %v417_v27 = vpack.c.bf16 %v413_v20, %v412_v19  ;;  %v416_v32 = vpack.c.bf16 %v415_v9, %v414_v21 }
 0x220   :  { %v963_v33 = vunpack.i.h.bf16 %v961_v26  ;;  %v962_v36 = vunpack.i.l.bf16 %v961_v26 }
 0x221   :  { %529 = vmatprep.subr.bf16.mxu1 %v417_v27 }
 0x222   :  { %v946_v37 = vpop.permute.xlu0 %945  ;;  %530 = vmatpush1.bf16.msra.mxu1 %v416_v32  ;;  %v434_v38 = vsel %vm43_vm1, %v962_v36, %v942_v25  ;;  %v435_v39 = vsel %vm43_vm1, %v963_v33, %v943_v23  ;;  %v432_v47 = vsel %vm43_vm1, %v942_v25, %v962_v36  ;;  %v433_v48 = vsel %vm43_vm1, %v943_v23, %v963_v33  ;;  %v1378_v36 = vld [vmem:[%s1469_s3] sm:$0xff] }
 0x223   :  { %v948_v40 = vunpack.i.h.bf16 %v946_v37  ;;  %v947_v41 = vunpack.i.l.bf16 %v946_v37  ;;  %v966_v42 = vpop.permute.xlu1 %965  ;;  %531 = vmatprep.subr.bf16.mxu1 %v421_v34  ;;  %v437_v46 = vpack.c.bf16 %v435_v39, %v434_v38  ;;  %v436_v54 = vpack.c.bf16 %v433_v48, %v432_v47 }
 0x224   :  { %v968_v43 = vunpack.i.h.bf16 %v966_v42  ;;  %v967_v44 = vunpack.i.l.bf16 %v966_v42  ;;  %v803_v37 = vcombine.high %v1378_v36, %v1378_v36 }
 0x226   :  { %v951_v49 = vpop.permute.xlu0 %950  ;;  %532 = vmatpush1.bf16.msra.mxu1 %v420_v35  ;;  %v451_v30 = vsel %vm448_vm13, %v967_v44, %v947_v41  ;;  %v452_v31 = vsel %vm448_vm13, %v968_v43, %v948_v40  ;;  %v449_v56 = vsel %vm448_vm13, %v947_v41, %v967_v44  ;;  %v450_v28 = vsel %vm448_vm13, %v948_v40, %v968_v43 }
 0x227   :  { %v953_v34 = vunpack.i.h.bf16 %v951_v49  ;;  %v952_v50 = vunpack.i.l.bf16 %v951_v49  ;;  %v971_v51 = vpop.permute.xlu1 %970  ;;  %533 = vmatprep.subr.bf16.mxu1 %v437_v46  ;;  %v454_v55 = vpack.c.bf16 %v452_v31, %v451_v30  ;;  %v453_v63 = vpack.c.bf16 %v450_v28, %v449_v56  ;;  %804 = vmatprep.mubr.msk.bf16.mxu0 %vm235_vm0, %v803_v37 }
 0x228   :  { %v973_v52 = vunpack.i.h.bf16 %v971_v51  ;;  %v972_v53 = vunpack.i.l.bf16 %v971_v51 }
 0x22a   :  { %v956_v29 = vpop.permute.xlu0 %955  ;;  %534 = vmatpush1.bf16.msra.mxu1 %v436_v54  ;;  %v467_v35 = vsel %vm77_vm3, %v972_v53, %v952_v50  ;;  %v468_v57 = vsel %vm77_vm3, %v973_v52, %v953_v34  ;;  %v465_v1 = vsel %vm77_vm3, %v952_v50, %v972_v53  ;;  %v466_v2 = vsel %vm77_vm3, %v953_v34, %v973_v52 }
 0x22b   :  { %v958_v58 = vunpack.i.h.bf16 %v956_v29  ;;  %v957_v59 = vunpack.i.l.bf16 %v956_v29  ;;  %v976_v60 = vpop.permute.xlu1 %975  ;;  %535 = vmatprep.subr.bf16.mxu1 %v454_v55  ;;  %v470_v0 = vpack.c.bf16 %v468_v57, %v467_v35  ;;  %v469_v5 = vpack.c.bf16 %v466_v2, %v465_v1 }
 0x22c   :  { %v978_v61 = vunpack.i.h.bf16 %v976_v60  ;;  %v977_v62 = vunpack.i.l.bf16 %v976_v60 }
 0x22e   :  { %536 = vmatpush1.bf16.msra.mxu1 %v453_v63  ;;  %v483_v3 = vsel %vm94_vm4, %v977_v62, %v957_v59  ;;  %v484_v4 = vsel %vm94_vm4, %v978_v61, %v958_v58  ;;  %v481_v7 = vsel %vm94_vm4, %v957_v59, %v977_v62  ;;  %v482_v8 = vsel %vm94_vm4, %v958_v58, %v978_v61 }
 0x22f   :  { %537 = vmatprep.subr.bf16.mxu1 %v470_v0  ;;  %v486_v6 = vpack.c.bf16 %v484_v4, %v483_v3  ;;  %v485_v11 = vpack.c.bf16 %v482_v8, %v481_v7 }
 0x232   :  { %538 = vmatpush1.bf16.msra.mxu1 %v469_v5 }
 0x233   :  { %539 = vmatprep.subr.bf16.mxu1 %v486_v6 }
 0x236   :  { %540 = vmatpush1.bf16.msra.mxu1 %v485_v11 }
 0x237   :  { %541 = vmatprep.subr.bf16.mxu1 %v1084_v45 }
 0x23a   :  { %542 = vmatpush1.bf16.msra.mxu1 %v1084_v45 }
 0x23d   :  { %556 = vmatmul.mubr.bf16.vlgmr.msra.gmra.mrb[0].mxu1 %v1071_v12 }
 0x310   :  { %v557_v13 = vpop.f32.mrb[0].mxu1 }
 0x311   :  { %v566_v14 = vmax.f32 %v557_v13, 0.0  ;;  %v559_v15 = vpop.f32.mrb[1].mxu1 }
 0x312   :  { %v567_v16 = vmax.f32 %v559_v15, 0.0  ;;  %v561_v17 = vpop.f32.mrb[2].mxu1 }
 0x313   :  { %v568_v18 = vmax.f32 %v561_v17, 0.0  ;;  %v563_v19 = vpop.f32.mrb[3].mxu1  ;;  %v1340_v21 = vmul.f32 %v566_v14, %v1215_v22 }
 0x314   :  { %v569_v20 = vmax.f32 %v563_v19, 0.0  ;;  %v1346_v23 = vmul.f32 %v567_v16, %v1217_v24 }
 0x315   :  { %v1343_v9 = vmul.f32 %v568_v18, %v1215_v22 }
 0x316   :  { %v1349_v25 = vmul.f32 %v569_v20, %v1217_v24 }
 0x317   :  { %v979_v26 = vpack.i.bf16 %v1343_v9, %v1340_v21  ;;  %v638_v33 = vpack.c.bf16 %v1343_v9, %v1340_v21 }
 0x318   :  { %v999_v27 = vpack.i.bf16 %v1349_v25, %v1346_v23  ;;  %v639_v32 = vpack.c.bf16 %v1349_v25, %v1346_v23 }
 0x319   :  { %980 = vrot.lane.b32.xlu0 %v979_v26, %s1085_s4 }
 0x31a   :  { %1000 = vrot.lane.b32.xlu1 %v999_v27, %s1085_s4 }
 0x31d   :  { %985 = vrot.lane.b32.xlu0 %v979_v26, %s1086_s25 }
 0x31e   :  { %1005 = vrot.lane.b32.xlu1 %v999_v27, %s1086_s25 }
 0x321   :  { %990 = vrot.lane.b32.xlu0 %v979_v26, %s1087_s26 }
 0x322   :  { %1010 = vrot.lane.b32.xlu1 %v999_v27, %s1087_s26 }
 0x325   :  { %995 = vrot.lane.b32.xlu0 %v979_v26, %s1088_s0 }
 0x326   :  { %1015 = vrot.lane.b32.xlu1 %v999_v27, %s1088_s0 }
 0x329   :  { %1020 = vrot.lane.b32.xlu0 %v979_v26, %s1077_s27 }
 0x32a   :  { %1035 = vrot.lane.b32.xlu1 %v999_v27, %s1077_s27 }
 0x32d   :  { %1025 = vrot.lane.b32.xlu0 %v979_v26, %s1089_s30 }
 0x32e   :  { %1040 = vrot.lane.b32.xlu1 %v999_v27, %s1089_s30 }
 0x331   :  { %1030 = vrot.lane.b32.xlu0 %v979_v26, %s1078_s28 }
 0x332   :  { %1045 = vrot.lane.b32.xlu1 %v999_v27, %s1078_s28 }
 0x335   :  { %1050 = vrot.lane.b32.xlu0 %v979_v26, %s1079_s29 }
 0x336   :  { %1055 = vrot.lane.b32.xlu1 %v999_v27, %s1079_s29 }
 0x38b   :  { %v981_v38 = vpop.permute.xlu0 %980 }
 0x38c   :  { %v983_v39 = vunpack.i.h.bf16 %v981_v38  ;;  %v982_v40 = vunpack.i.l.bf16 %v981_v38  ;;  %v1001_v41 = vpop.permute.xlu1 %1000 }
 0x38d   :  { %v1003_v42 = vunpack.i.h.bf16 %v1001_v41  ;;  %v1002_v43 = vunpack.i.l.bf16 %v1001_v41 }
 0x38f   :  { %v585_v44 = vsel %vm360_vm9, %v1003_v42, %v983_v39  ;;  %v584_v46 = vsel %vm360_vm9, %v1002_v43, %v982_v40  ;;  %v986_v47 = vpop.permute.xlu0 %985  ;;  %v582_v48 = vsel %vm360_vm9, %v982_v40, %v1002_v43  ;;  %v583_v49 = vsel %vm360_vm9, %v983_v39, %v1003_v42 }
 0x390   :  { %v586_v30 = vpack.c.bf16 %v585_v44, %v584_v46  ;;  %v988_v31 = vunpack.i.h.bf16 %v986_v47  ;;  %v987_v34 = vunpack.i.l.bf16 %v986_v47  ;;  %v1006_v50 = vpop.permute.xlu1 %1005  ;;  %v587_v51 = vpack.c.bf16 %v583_v49, %v582_v48 }
 0x391   :  { %v1008_v52 = vunpack.i.h.bf16 %v1006_v50  ;;  %v1007_v53 = vunpack.i.l.bf16 %v1006_v50 }
 0x392   :  { %736 = vmatprep.subr.bf16.mxu0 %v587_v51 }
 0x393   :  { %v601_v54 = vsel %vm377_vm10, %v1008_v52, %v988_v31  ;;  %v600_v55 = vsel %vm377_vm10, %v1007_v53, %v987_v34  ;;  %v991_v56 = vpop.permute.xlu0 %990  ;;  %737 = vmatpush1.bf16.msra.mxu0 %v586_v30  ;;  %v598_v28 = vsel %vm377_vm10, %v987_v34, %v1007_v53  ;;  %v599_v29 = vsel %vm377_vm10, %v988_v31, %v1008_v52 }
 0x394   :  { %v602_v35 = vpack.c.bf16 %v601_v54, %v600_v55  ;;  %v993_v57 = vunpack.i.h.bf16 %v991_v56  ;;  %v992_v58 = vunpack.i.l.bf16 %v991_v56  ;;  %v1011_v59 = vpop.permute.xlu1 %1010  ;;  %v603_v60 = vpack.c.bf16 %v599_v29, %v598_v28 }
 0x395   :  { %v1013_v61 = vunpack.i.h.bf16 %v1011_v59  ;;  %v1012_v62 = vunpack.i.l.bf16 %v1011_v59 }
 0x396   :  { %738 = vmatprep.subr.bf16.mxu0 %v603_v60 }
 0x397   :  { %v617_v63 = vsel %vm394_vm11, %v1013_v61, %v993_v57  ;;  %v616_v0 = vsel %vm394_vm11, %v1012_v62, %v992_v58  ;;  %v996_v1 = vpop.permute.xlu0 %995  ;;  %739 = vmatpush1.bf16.msra.mxu0 %v602_v35  ;;  %v614_v2 = vsel %vm394_vm11, %v992_v58, %v1012_v62  ;;  %v615_v3 = vsel %vm394_vm11, %v993_v57, %v1013_v61 }
 0x398   :  { %v618_v4 = vpack.c.bf16 %v617_v63, %v616_v0  ;;  %v998_v5 = vunpack.i.h.bf16 %v996_v1  ;;  %v997_v6 = vunpack.i.l.bf16 %v996_v1  ;;  %v1016_v7 = vpop.permute.xlu1 %1015  ;;  %v619_v8 = vpack.c.bf16 %v615_v3, %v614_v2 }
 0x399   :  { %v1018_v11 = vunpack.i.h.bf16 %v1016_v7  ;;  %v1017_v12 = vunpack.i.l.bf16 %v1016_v7 }
 0x39a   :  { %740 = vmatprep.subr.bf16.mxu0 %v619_v8 }
 0x39b   :  { %v633_v13 = vsel %vm411_vm12, %v1018_v11, %v998_v5  ;;  %v632_v14 = vsel %vm411_vm12, %v1017_v12, %v997_v6  ;;  %v1021_v15 = vpop.permute.xlu0 %1020  ;;  %741 = vmatpush1.bf16.msra.mxu0 %v618_v4  ;;  %v630_v16 = vsel %vm411_vm12, %v997_v6, %v1017_v12  ;;  %v631_v17 = vsel %vm411_vm12, %v998_v5, %v1018_v11 }
 0x39c   :  { %v634_v18 = vpack.c.bf16 %v633_v13, %v632_v14  ;;  %v1023_v19 = vunpack.i.h.bf16 %v1021_v15  ;;  %v1022_v20 = vunpack.i.l.bf16 %v1021_v15  ;;  %v1036_v26 = vpop.permute.xlu1 %1035  ;;  %v635_v27 = vpack.c.bf16 %v631_v17, %v630_v16 }
 0x39d   :  { %v1038_v37 = vunpack.i.h.bf16 %v1036_v26  ;;  %v1037_v38 = vunpack.i.l.bf16 %v1036_v26  ;;  %v802_v6 = vcombine.low %v1378_v36, %v1378_v36 }
 0x39e   :  { %742 = vmatprep.subr.bf16.mxu0 %v635_v27 }
 0x39f   :  { %v1026_v39 = vpop.permute.xlu0 %1025  ;;  %743 = vmatpush1.bf16.msra.mxu0 %v634_v18  ;;  %v652_v40 = vsel %vm43_vm1, %v1037_v38, %v1022_v20  ;;  %v653_v41 = vsel %vm43_vm1, %v1038_v37, %v1023_v19  ;;  %v651_v48 = vsel %vm43_vm1, %v1023_v19, %v1038_v37  ;;  %v650_v49 = vsel %vm43_vm1, %v1022_v20, %v1037_v38 }
 0x3a0   :  { %v1028_v42 = vunpack.i.h.bf16 %v1026_v39  ;;  %v1027_v43 = vunpack.i.l.bf16 %v1026_v39  ;;  %v1041_v44 = vpop.permute.xlu1 %1040  ;;  %744 = vmatprep.subr.bf16.mxu0 %v639_v32  ;;  %v655_v30 = vpack.c.bf16 %v653_v41, %v652_v40  ;;  %v654_v51 = vpack.c.bf16 %v651_v48, %v650_v49 }
 0x3a1   :  { %v1043_v46 = vunpack.i.h.bf16 %v1041_v44  ;;  %v1042_v47 = vunpack.i.l.bf16 %v1041_v44 }
 0x3a3   :  { %v1031_v31 = vpop.permute.xlu0 %1030  ;;  %745 = vmatpush1.bf16.msra.mxu0 %v638_v33  ;;  %v668_v34 = vsel %vm448_vm13, %v1042_v47, %v1027_v43  ;;  %v669_v23 = vsel %vm448_vm13, %v1043_v46, %v1028_v42  ;;  %v667_v54 = vsel %vm448_vm13, %v1028_v42, %v1043_v46  ;;  %v666_v21 = vsel %vm448_vm13, %v1027_v43, %v1042_v47 }
 0x3a4   :  { %v1033_v25 = vunpack.i.h.bf16 %v1031_v31  ;;  %v1032_v32 = vunpack.i.l.bf16 %v1031_v31  ;;  %v1046_v50 = vpop.permute.xlu1 %1045  ;;  %746 = vmatprep.subr.bf16.mxu0 %v655_v30  ;;  %v671_v9 = vpack.c.bf16 %v669_v23, %v668_v34  ;;  %v670_v57 = vpack.c.bf16 %v667_v54, %v666_v21 }
 0x3a5   :  { %v1048_v52 = vunpack.i.h.bf16 %v1046_v50  ;;  %v1047_v53 = vunpack.i.l.bf16 %v1046_v50 }
 0x3a7   :  { %v1051_v33 = vpop.permute.xlu0 %1050  ;;  %747 = vmatpush1.bf16.msra.mxu0 %v654_v51  ;;  %v684_v55 = vsel %vm77_vm3, %v1047_v53, %v1032_v32  ;;  %v685_v56 = vsel %vm77_vm3, %v1048_v52, %v1033_v25  ;;  %v683_v60 = vsel %vm77_vm3, %v1033_v25, %v1048_v52  ;;  %v682_v61 = vsel %vm77_vm3, %v1032_v32, %v1047_v53 }
 0x3a8   :  { %v1053_v28 = vunpack.i.h.bf16 %v1051_v33  ;;  %v1052_v29 = vunpack.i.l.bf16 %v1051_v33  ;;  %v1056_v35 = vpop.permute.xlu1 %1055  ;;  %748 = vmatprep.subr.bf16.mxu0 %v671_v9  ;;  %v687_v62 = vpack.c.bf16 %v685_v56, %v684_v55  ;;  %v686_v1 = vpack.c.bf16 %v683_v60, %v682_v61 }
 0x3a9   :  { %v1058_v58 = vunpack.i.h.bf16 %v1056_v35  ;;  %v1057_v59 = vunpack.i.l.bf16 %v1056_v35 }
 0x3ab   :  { %749 = vmatpush1.bf16.msra.mxu0 %v670_v57  ;;  %v700_v63 = vsel %vm94_vm4, %v1057_v59, %v1052_v29  ;;  %v701_v0 = vsel %vm94_vm4, %v1058_v58, %v1053_v28  ;;  %v699_v2 = vsel %vm94_vm4, %v1053_v28, %v1058_v58  ;;  %v698_v3 = vsel %vm94_vm4, %v1052_v29, %v1057_v59 }
 0x3ac   :  { %750 = vmatprep.subr.bf16.mxu0 %v687_v62  ;;  %v703_v4 = vpack.c.bf16 %v701_v0, %v700_v63  ;;  %v702_v5 = vpack.c.bf16 %v699_v2, %v698_v3 }
 0x3af   :  { %751 = vmatpush1.bf16.msra.mxu0 %v686_v1 }
 0x3b0   :  { %752 = vmatprep.subr.bf16.mxu0 %v703_v4 }
 0x3b3   :  { %753 = vmatpush1.bf16.msra.mxu0 %v702_v5 }
 0x3b4   :  { %754 = vmatprep.subr.bf16.mxu0 %v1084_v45 }
 0x3b7   :  { %755 = vmatpush1.bf16.msra.mxu0 %v1084_v45 }
 0x3ba   :  { %769 = vmatmul.mubr.bf16.vlgmr.msra.gmra.mrb[16].mxu0 %v802_v6 }
 0x48d   :  { %v770_v7 = vpop.f32.mrb[16].mxu0 }
 0x48e   :  { %v777_v8 = vmax.f32 %v770_v7, 0.0  ;;  %v772_v11 = vpop.f32.mrb[17].mxu0 }
 0x48f   :  { %v778_v12 = vmax.f32 %v772_v11, 0.0  ;;  %v774_v13 = vpop.f32.mrb[18].mxu0 }
 0x490   :  { %v779_v10 = vmul.f32 %v777_v8, %v1215_v22  ;;  %v775_v14 = vpop.f32.mrb[19].mxu0 }
 0x491   :  { %v780_v15 = vmul.f32 %v778_v12, %v1217_v24 }
 0x492   :  { %781 = vst [vmem:[%s1470_s5] sm:$0xff] %v779_v10 }
 0x493   :  { %782 = vst [vmem:[%s1470_s5 + $0x8] sm:$0xff] %v780_v15 }

</bundles_post_ra>
